<compile_context>
chip_gen: v7x
topology: tpu7x:2x2x1
jax: 0.10.0
libtpu: 0.0.40
codegen_flags: <defaults>
</compile_context>

<pallas_src>
import jax
import jax.numpy as jnp
from jax.experimental import pallas as pl
from jax.experimental.pallas import tpu as pltpu


def _double_q_kernel(s_ref, a_ref, w1_ref, b1_ref, w2_ref, b2_ref,
                     w3a_ref, w3b_ref, b3_ref, q_ref, x_ref):
    """Whole double-Q forward in one invocation.

    s_ref:   (B, Sd) f32        w1_ref:  (Dp, 2*H1) bf16  (rows >= Sd+Ad are zero)
    a_ref:   (B, Ad) f32        b1_ref:  (1, 2*H1)  f32
    w2_ref:  (2*H1, 2*H2) bf16  (block-diagonal)
    b2_ref:  (1, 2*H2) f32
    w3a_ref: (1, 2*H2) f32      (net-1 head column, zeros on net-2 lanes)
    w3b_ref: (1, 2*H2) f32      (net-2 head column, zeros on net-1 lanes)
    b3_ref:  (1, 2) f32
    q_ref:   (B, 2) f32         (single merged output: [q1 | q2])
    x_ref:   (B, Dp) f32 VMEM scratch for the fused [state | action] concat
    """
    sd = s_ref.shape[1]
    ad = a_ref.shape[1]

    # Fused torch.cat([state, action], 1): zero the padded scratch and drop the
    # two operands in with lane-masked stores -> a single layer-1 MXU pass.
    x_ref[...] = jnp.zeros_like(x_ref)
    x_ref[:, 0:sd] = s_ref[...]
    x_ref[:, sd:sd + ad] = a_ref[...]

    # Layer 1: one MXU pass, bf16 operands, f32 accumulation; bias+ReLU in f32.
    h = jnp.dot(x_ref[...].astype(jnp.bfloat16), w1_ref[...],
                preferred_element_type=jnp.float32)
    h = jnp.maximum(h + b1_ref[...], 0.0)

    # Layer 2: block-diagonal -> both nets in one 128-wide MXU pass.
    h = jnp.dot(h.astype(jnp.bfloat16), w2_ref[...],
                preferred_element_type=jnp.float32)
    h = jnp.maximum(h + b2_ref[...], 0.0)

    # Output heads on VPU + XLU instead of a third (N=2) MXU pass.
    # w3a/w3b are lane-masked on the host, so plain full-width reduces suffice.
    q1 = jnp.sum(h * w3a_ref[...], axis=-1, keepdims=True)   # (B, 1)
    q2 = jnp.sum(h * w3b_ref[...], axis=-1, keepdims=True)   # (B, 1)

    # Assemble [q1 | q2] via a lane-index select (no minor-dim concat) and
    # write the merged result with a single store.
    lane = jax.lax.broadcasted_iota(jnp.int32, (q_ref.shape[0], 2), 1)
    q = jnp.where(lane == 0, q1, q2) + b3_ref[...]
    q_ref[...] = q.astype(q_ref.dtype)


@jax.jit
def mlp_double_q_forward(state, action, packed):
    """Pallas forward of MLPDoubleQFunction.

    state:  (B, state_dim) float32
    action: (B, action_dim) float32
    packed: output of pack_params
    returns (q1, q2), each (B, 1) — matches the PyTorch module's tuple output.
    """
    B = state.shape[0]
    d_pad = packed["w1"].shape[0]
    vmem = pl.BlockSpec(memory_space=pltpu.MemorySpace.VMEM)

    q = pl.pallas_call(
        _double_q_kernel,
        out_shape=jax.ShapeDtypeStruct((B, 2), jnp.float32),
        in_specs=[vmem] * 9,
        out_specs=vmem,
        scratch_shapes=[pltpu.VMEM((B, d_pad), jnp.float32)],
    )(
        state.astype(jnp.float32), action.astype(jnp.float32),
        packed["w1"], packed["b1"], packed["w2"], packed["b2"],
        packed["w3a"], packed["w3b"], packed["b3"],
    )
    # Cheap XLA slices inside the jit; the kernel itself does one merged store.
    return q[:, 0:1], q[:, 1:2]


def init_q_params(key, state_dim, action_dim, hidden_sizes=(64, 64)):
    """One MLPQFunction's params, mirroring xavier_uniform_(gain=1) + zero bias.

    Weights are stored pre-transposed as (in, out) so the forward is x @ W,
    equivalent to PyTorch's x @ W_pt.T.
    """
    dims = [state_dim + action_dim] + list(hidden_sizes) + [1]

    def xavier(k, fan_in, fan_out):
        bound = float(jnp.sqrt(6.0 / (fan_in + fan_out)))
        return jax.random.uniform(k, (fan_in, fan_out), jnp.float32, -bound, bound)

    ks = jax.random.split(key, 3)
    return {
        "w1": xavier(ks[0], dims[0], dims[1]),
        "b1": jnp.zeros((dims[1],), jnp.float32),
        "w2": xavier(ks[1], dims[1], dims[2]),
        "b2": jnp.zeros((dims[2],), jnp.float32),
        "w3": xavier(ks[2], dims[2], dims[3]),
        "b3": jnp.zeros((dims[3],), jnp.float32),
    }


def pack_params(p1, p2, state_dim, action_dim, weight_dtype=jnp.bfloat16):
    """One-time host-side packing of the two nets.

    * W1 is zero-row-padded so the fused in-kernel concat needs no edge cases.
    * W2 is block-diagonal (one 128-wide MXU pass for both nets).
    * W1/W2 are stored in bf16 (single-pass MXU on v6e/v7x, half the DMA);
      biases and the lane-masked head columns stay f32 (VPU math stays f32).
    """
    H1 = p1["w1"].shape[1]
    H2 = p1["w2"].shape[1]
    D = state_dim + action_dim
    d_pad = ((D + 7) // 8) * 8

    w1 = jnp.concatenate([p1["w1"], p2["w1"]], axis=1)              # (D, 2*H1)
    w1 = jnp.zeros((d_pad, 2 * H1), jnp.float32).at[:D, :].set(w1)  # zero-pad rows
    b1 = jnp.concatenate([p1["b1"], p2["b1"]])[None, :]             # (1, 2*H1)

    z2 = jnp.zeros((H1, H2), jnp.float32)
    w2 = jnp.block([[p1["w2"], z2], [z2, p2["w2"]]])                # (2*H1, 2*H2)
    b2 = jnp.concatenate([p1["b2"], p2["b2"]])[None, :]             # (1, 2*H2)

    zH = jnp.zeros((H2,), jnp.float32)
    w3a = jnp.concatenate([p1["w3"][:, 0], zH])[None, :]            # (1, 2*H2)
    w3b = jnp.concatenate([zH, p2["w3"][:, 0]])[None, :]            # (1, 2*H2)
    b3 = jnp.concatenate([p1["b3"], p2["b3"]])[None, :]             # (1, 2)

    return {"w1": w1.astype(weight_dtype), "b1": b1,
            "w2": w2.astype(weight_dtype), "b2": b2,
            "w3a": w3a, "w3b": w3b, "b3": b3}


def _reference_forward_f32(state, action, p1, p2):
    """Pure-f32 JAX reference matching the PyTorch module exactly."""
    x = jnp.concatenate([state, action], axis=1)

    def net(p):
        h = jax.nn.relu(x @ p["w1"] + p["b1"])
        h = jax.nn.relu(h @ p["w2"] + p["b2"])
        return h @ p["w3"] + p["b3"]

    return net(p1), net(p2)


def _reference_forward_matched(state, action, p1, p2):
    """Reference mirroring the kernel numerics (bf16 MXU operands, f32 accum,
    f32 elementwise, VPU-style output head) for a tight correctness check."""
    x = jnp.concatenate([state, action], axis=1).astype(jnp.bfloat16)

    def net(p):
        h = jnp.dot(x, p["w1"].astype(jnp.bfloat16),
                    preferred_element_type=jnp.float32)
        h = jax.nn.relu(h + p["b1"])
        h = jnp.dot(h.astype(jnp.bfloat16), p["w2"].astype(jnp.bfloat16),
                    preferred_element_type=jnp.float32)
        h = jax.nn.relu(h + p["b2"])
        return jnp.sum(h * p["w3"][:, 0][None, :], axis=-1, keepdims=True) + p["b3"]

    return net(p1), net(p2)


if __name__ == "__main__":
    key = jax.random.PRNGKey(0)
    k_s, k_a, k_p1, k_p2, k_b = jax.random.split(key, 5)

    batch = 8
    state_dim, action_dim = 8, 4
    hidden_sizes = (64, 64)

    state = jax.random.normal(k_s, (batch, state_dim), jnp.float32)
    action = jax.random.normal(k_a, (batch, action_dim), jnp.float32)

    p1 = init_q_params(k_p1, state_dim, action_dim, hidden_sizes)
    p2 = init_q_params(k_p2, state_dim, action_dim, hidden_sizes)

    # Use nonzero biases for the self-test (PyTorch init sets them to 0) so the
    # bias-add path of the kernel is actually exercised by the comparison.
    kb = jax.random.split(k_b, 6)
    p1["b1"] = 0.1 * jax.random.normal(kb[0], p1["b1"].shape, jnp.float32)
    p1["b2"] = 0.1 * jax.random.normal(kb[1], p1["b2"].shape, jnp.float32)
    p1["b3"] = 0.1 * jax.random.normal(kb[2], p1["b3"].shape, jnp.float32)
    p2["b1"] = 0.1 * jax.random.normal(kb[3], p2["b1"].shape, jnp.float32)
    p2["b2"] = 0.1 * jax.random.normal(kb[4], p2["b2"].shape, jnp.float32)
    p2["b3"] = 0.1 * jax.random.normal(kb[5], p2["b3"].shape, jnp.float32)

    packed = pack_params(p1, p2, state_dim, action_dim)

    q1, q2 = mlp_double_q_forward(state, action, packed)
    q1 = jax.block_until_ready(q1)
    q2 = jax.block_until_ready(q2)

    assert q1.shape == (batch, 1), q1.shape
    assert q2.shape == (batch, 1), q2.shape

    # Tight check against a reference that mirrors the kernel's numerics
    # (validates the packing / fused-concat / head logic).
    m1, m2 = _reference_forward_matched(state, action, p1, p2)
    assert jnp.allclose(q1, m1, atol=1e-3, rtol=1e-3), "q1 mismatch vs matched reference"
    assert jnp.allclose(q2, m2, atol=1e-3, rtol=1e-3), "q2 mismatch vs matched reference"

    # Loose sanity check vs the pure-f32 PyTorch-equivalent reference
    # (tolerance covers the bf16 MXU operands used on v6e/v7x per the review).
    r1, r2 = _reference_forward_f32(state, action, p1, p2)
    assert jnp.allclose(q1, r1, atol=5e-2, rtol=5e-2), "q1 drift vs f32 reference"
    assert jnp.allclose(q2, r2, atol=5e-2, rtol=5e-2), "q2 drift vs f32 reference"

    print("KERNEL_OK")
</pallas_src>

<mosaic_0001>
module attributes {stable_mosaic.version = 11 : i64} {
  func.func @_double_q_kernel(%arg0: memref<8x8xf32, #tpu.memory_space<vmem>>, %arg1: memref<8x4xf32, #tpu.memory_space<vmem>>, %arg2: memref<16x128xbf16, #tpu.memory_space<vmem>>, %arg3: memref<1x128xf32, #tpu.memory_space<vmem>>, %arg4: memref<128x128xbf16, #tpu.memory_space<vmem>>, %arg5: memref<1x128xf32, #tpu.memory_space<vmem>>, %arg6: memref<1x128xf32, #tpu.memory_space<vmem>>, %arg7: memref<1x128xf32, #tpu.memory_space<vmem>>, %arg8: memref<1x2xf32, #tpu.memory_space<vmem>>, %arg9: memref<8x2xf32, #tpu.memory_space<vmem>>, %arg10: memref<8x16xf32, #tpu.memory_space<vmem>>) attributes {dimension_semantics = [], scalar_prefetch = 0 : i64, scratch_operands = 1 : i64, tpu.core_type = #tpu.core_type<tc>} {
    %cst = arith.constant 0.000000e+00 : f32
    %0 = vector.broadcast %cst : f32 to vector<8x16xf32>
    %c0 = arith.constant 0 : index
    %c0_0 = arith.constant 0 : index
    %1 = vector.load %arg10[%c0, %c0_0] : memref<8x16xf32, #tpu.memory_space<vmem>>, vector<8x16xf32>
    tpu.vector_store %arg10[%c0, %c0_0], %0 {strides = array<i32>} : memref<8x16xf32, #tpu.memory_space<vmem>>, vector<8x16xf32>,
    %c0_1 = arith.constant 0 : index
    %c0_2 = arith.constant 0 : index
    %2 = vector.load %arg0[%c0_1, %c0_2] : memref<8x8xf32, #tpu.memory_space<vmem>>, vector<8x8xf32>
    %c0_3 = arith.constant 0 : index
    %c0_4 = arith.constant 0 : index
    %3 = vector.load %arg10[%c0_3, %c0_4] : memref<8x16xf32, #tpu.memory_space<vmem>>, vector<8x8xf32>
    tpu.vector_store %arg10[%c0_3, %c0_4], %2 {strides = array<i32>} : memref<8x16xf32, #tpu.memory_space<vmem>>, vector<8x8xf32>,
    %c0_5 = arith.constant 0 : index
    %c0_6 = arith.constant 0 : index
    %4 = vector.load %arg1[%c0_5, %c0_6] : memref<8x4xf32, #tpu.memory_space<vmem>>, vector<8x4xf32>
    %c0_7 = arith.constant 0 : index
    %c8 = arith.constant 8 : index
    %5 = vector.load %arg10[%c0_7, %c8] : memref<8x16xf32, #tpu.memory_space<vmem>>, vector<8x4xf32>
    tpu.vector_store %arg10[%c0_7, %c8], %4 {strides = array<i32>} : memref<8x16xf32, #tpu.memory_space<vmem>>, vector<8x4xf32>,
    %c0_8 = arith.constant 0 : index
    %c0_9 = arith.constant 0 : index
    %6 = vector.load %arg10[%c0_8, %c0_9] : memref<8x16xf32, #tpu.memory_space<vmem>>, vector<8x16xf32>
    %7 = arith.truncf %6 : vector<8x16xf32> to vector<8x16xbf16>
    %c0_10 = arith.constant 0 : index
    %c0_11 = arith.constant 0 : index
    %8 = vector.load %arg2[%c0_10, %c0_11] : memref<16x128xbf16, #tpu.memory_space<vmem>>, vector<16x128xbf16>
    %cst_12 = arith.constant dense<0.000000e+00> : vector<8x128xf32>
    %9 = tpu.matmul %7, %8, %cst_12 {dimension_numbers = #tpu.dot_dimension_numbers<[1], [0], [0], [1], [0, 0, 1, 1], [], []>} : vector<8x16xbf16>, vector<16x128xbf16>, vector<8x128xf32> -> vector<8x128xf32>
    %c0_13 = arith.constant 0 : index
    %c0_14 = arith.constant 0 : index
    %10 = vector.load %arg3[%c0_13, %c0_14] : memref<1x128xf32, #tpu.memory_space<vmem>>, vector<1x128xf32>
    %11 = vector.broadcast %10 : vector<1x128xf32> to vector<8x128xf32>
    %12 = arith.addf %9, %11 : vector<8x128xf32>
    %cst_15 = arith.constant 0.000000e+00 : f32
    %13 = vector.broadcast %cst_15 : f32 to vector<8x128xf32>
    %14 = arith.maximumf %12, %13 : vector<8x128xf32>
    %15 = arith.truncf %14 : vector<8x128xf32> to vector<8x128xbf16>
    %c0_16 = arith.constant 0 : index
    %c0_17 = arith.constant 0 : index
    %16 = vector.load %arg4[%c0_16, %c0_17] : memref<128x128xbf16, #tpu.memory_space<vmem>>, vector<128x128xbf16>
    %cst_18 = arith.constant dense<0.000000e+00> : vector<8x128xf32>
    %17 = tpu.matmul %15, %16, %cst_18 {dimension_numbers = #tpu.dot_dimension_numbers<[1], [0], [0], [1], [0, 0, 1, 1], [], []>} : vector<8x128xbf16>, vector<128x128xbf16>, vector<8x128xf32> -> vector<8x128xf32>
    %c0_19 = arith.constant 0 : index
    %c0_20 = arith.constant 0 : index
    %18 = vector.load %arg5[%c0_19, %c0_20] : memref<1x128xf32, #tpu.memory_space<vmem>>, vector<1x128xf32>
    %19 = vector.broadcast %18 : vector<1x128xf32> to vector<8x128xf32>
    %20 = arith.addf %17, %19 : vector<8x128xf32>
    %cst_21 = arith.constant 0.000000e+00 : f32
    %21 = vector.broadcast %cst_21 : f32 to vector<8x128xf32>
    %22 = arith.maximumf %20, %21 : vector<8x128xf32>
    %c0_22 = arith.constant 0 : index
    %c0_23 = arith.constant 0 : index
    %23 = vector.load %arg6[%c0_22, %c0_23] : memref<1x128xf32, #tpu.memory_space<vmem>>, vector<1x128xf32>
    %24 = vector.broadcast %23 : vector<1x128xf32> to vector<8x128xf32>
    %25 = arith.mulf %22, %24 : vector<8x128xf32>
    %cst_24 = arith.constant dense<0.000000e+00> : vector<8xf32>
    %26 = vector.multi_reduction <add>, %25, %cst_24 [1] : vector<8x128xf32> to vector<8xf32>
    %27 = vector.shape_cast %26 : vector<8xf32> to vector<8x1xf32>
    %c0_25 = arith.constant 0 : index
    %c0_26 = arith.constant 0 : index
    %28 = vector.load %arg7[%c0_25, %c0_26] : memref<1x128xf32, #tpu.memory_space<vmem>>, vector<1x128xf32>
    %29 = vector.broadcast %28 : vector<1x128xf32> to vector<8x128xf32>
    %30 = arith.mulf %22, %29 : vector<8x128xf32>
    %cst_27 = arith.constant dense<0.000000e+00> : vector<8xf32>
    %31 = vector.multi_reduction <add>, %30, %cst_27 [1] : vector<8x128xf32> to vector<8xf32>
    %32 = vector.shape_cast %31 : vector<8xf32> to vector<8x1xf32>
    %33 = tpu.iota {dimensions = array<i32: 1>} : vector<8x2xi32>
    %c0_i32 = arith.constant 0 : i32
    %34 = vector.broadcast %c0_i32 : i32 to vector<8x2xi32>
    %35 = arith.cmpi eq, %33, %34 : vector<8x2xi32>
    %36 = vector.shape_cast %27 : vector<8x1xf32> to vector<8x1xf32>
    %37 = vector.broadcast %36 : vector<8x1xf32> to vector<8x2xf32>
    %38 = vector.shape_cast %32 : vector<8x1xf32> to vector<8x1xf32>
    %39 = vector.broadcast %38 : vector<8x1xf32> to vector<8x2xf32>
    %40 = arith.select %35, %37, %39 : vector<8x2xi1>, vector<8x2xf32>
    %c0_28 = arith.constant 0 : index
    %c0_29 = arith.constant 0 : index
    %41 = vector.load %arg8[%c0_28, %c0_29] : memref<1x2xf32, #tpu.memory_space<vmem>>, vector<1x2xf32>
    %42 = vector.broadcast %41 : vector<1x2xf32> to vector<8x2xf32>
    %43 = arith.addf %40, %42 : vector<8x2xf32>
    %c0_30 = arith.constant 0 : index
    %c0_31 = arith.constant 0 : index
    %44 = vector.load %arg9[%c0_30, %c0_31] : memref<8x2xf32, #tpu.memory_space<vmem>>, vector<8x2xf32>
    tpu.vector_store %arg9[%c0_30, %c0_31], %43 {strides = array<i32>} : memref<8x2xf32, #tpu.memory_space<vmem>>, vector<8x2xf32>,
    return
  }
}

</mosaic_0001>

<bundles_post_ra>
// kernel: mlp_double_q_forward.1
= control target key start
LH: loop header
LB: loop body
LE: loop exit
PB: predicated region body
PF: predicated region fallthrough
CT: control target
= control target key end

     0   :  { %14 = vsyncpa [#allocation4], 0  ;;  %s363_s30 = smov [#allocation3]   ;;  %s460_s0 = inlined_call_operand.vmem [shape: f32[8,8], index: 0, kind: input, shape index: {}]   ;;  %s461_s1 = inlined_call_operand.vmem [shape: f32[8,4], index: 1, kind: input, shape index: {}]   ;;  %s462_s2 = inlined_call_operand.vmem [shape: bf16[16,128], index: 2, kind: input, shape index: {}]   ;;  %s463_s3 = inlined_call_operand.vmem [shape: f32[1,128], index: 3, kind: input, shape index: {}]   ;;  %s464_s4 = inlined_call_operand.hbm [shape: bf16[128,128], index: 4, kind: input, shape index: {}]   ;;  %s465_s5 = inlined_call_operand.vmem [shape: f32[1,128], index: 5, kind: input, shape index: {}]   ;;  %s466_s6 = inlined_call_operand.vmem [shape: f32[1,128], index: 6, kind: input, shape index: {}]   ;;  %s467_s7 = inlined_call_operand.vmem [shape: f32[1,128], index: 7, kind: input, shape index: {}]   ;;  %s468_s8 = inlined_call_operand.vmem [shape: f32[1,2], index: 8, kind: input, shape index: {}]   ;;  %s469_s9 = inlined_call_operand.vmem [shape: f32[8,2], index: 9, kind: output, shape index: {}]  }
   0x1   :  { %s28_s10 = sshll.u32 %s363_s30, 4  ;;  %s339_s13 = scalar_lea.hbm %s464_s4, 1024  ;;  %s29_s10 = int_to_ptr.vmem [resolvable:$true] %s28_s10 }
   0x2   :  { %p340_p0 = scmp.ne.s32.totalorder %s464_s4, %s339_s13  ;;  %p343_p1 = scmp.lt.u32.totalorder %s339_s13, %s464_s4 }
   0x4   :  { %p345_p2 = pnand %p343_p1, %p340_p0 }
   0x6   :  { %348 = shalt.err (!%p345_p2)
}
   0x7   :  { %s349_s18 = scalar_lea.vmem %s29_s10, 1024  ;;  %p354_p4 = scmp.lt.s32.totalorder %s29_s10, %s29_s10 }
   0x8   :  { %p350_p3 = scmp.ne.s32.totalorder %s29_s10, %s349_s18  ;;  %p355_p5 = scmp.lt.s32.totalorder %s349_s18, %s349_s18 }
   0xa   :  { %p356_p6 = por %p355_p5, %p354_p4 }
   0xc   :  { %p357_p7 = pnand %p356_p6, %p350_p3 }
   0xe   :  { %360 = shalt.err (!%p357_p7)
}
   0xf   :  { %s364_s19 = smov 64   ;;  %s365_s20 = smov 4  }
  0x10   :  { %34 = dma.hbm_to_vmem [thread:$0]  %s464_s4, 1024, %s29_s10, [#allocation4], %s364_s19, %s364_s19, %s365_s20  }
  0x11   :  { %361 = dma.done.wait [#allocation4], 1024  }
  0x12   :  { %362 = vsyncadd [#allocation4], 4294966272  ;;  %vm47_vm0 = vcmask 130048   ;;  %v366_v0 = vmov 0.0   ;;  %vm367_vm1 = vmmov 0   ;;  %vm50_vm2 = vcmask 64512  }
  0x13   :  { %48 = vst.msk [vmem:[#allocation2] sm:$0xff] %vm47_vm0, %v366_v0  ;;  %298 = vmatprep.subr.bf16.mxu0 %v366_v0  ;;  %304 = vmatprep.subr.bf16.mxu1 %v366_v0  ;;  %v52_v1 = vld [vmem:[%s461_s1] sm:$0xff]  ;;  %s368_s4 = smov 8   ;;  %v331_v4 = vld [vmem:[#allocation3] sm:$0xff]   ;;  %v332_v5 = vld [vmem:[#allocation3 + $0x8] sm:$0xff]   ;;  %vm57_vm3 = vcmask 97344   ;;  %v253_v34 = vlaneseq }
  0x14   :  { %300 = vmatprep.mubr.msk.bf16.mxu0 %vm367_vm1, %v366_v0  ;;  %320 = vmatprep.mubr.msk.bf16.mxu1 %vm367_vm1, %v366_v0  ;;  %v49_v2 = vld [vmem:[%s460_s0] sm:$0xff]  ;;  %v333_v6 = vld [vmem:[#allocation3 + $0x10] sm:$0xff]   ;;  %v335_v8 = vld [vmem:[#allocation3 + $0x20] sm:$0xff]   ;;  %vm265_vm5 = vcmask 15360  }
  0x15   :  { %54 = vrot.lane.b32.xlu0 %v52_v1, %s368_s4  ;;  %51 = vst.msk [vmem:[#allocation2] sm:$0xff] %vm50_vm2, %v49_v2  ;;  %v330_v3 = vld [vmem:[%s462_s2] sm:$0xff]   ;;  %305 = vmatpush3.bf16.msra.mxu1 %v331_v4  ;;  %v336_v9 = vld [vmem:[#allocation3 + $0x28] sm:$0xff]   ;;  %v337_v13 = vld [vmem:[#allocation3 + $0x30] sm:$0xff]   ;;  %v254_v35 = vand.u32 127, %v253_v34 }
  0x16   :  { %299 = vmatpush3.bf16.msra.mxu0 %v330_v3  ;;  %306 = vmatprep.subr.bf16.mxu1 %v366_v0  ;;  %v334_v7 = vld [vmem:[#allocation3 + $0x18] sm:$0xff]  }
  0x17   :  { %v338_v14 = vld [vmem:[#allocation3 + $0x38] sm:$0xff]   ;;  %vm255_vm4 = vcmp.eq.s32.totalorder %v254_v35, 0 }
  0x18   :  { %v272_v15 = vld [vmem:[%s463_s3] ss:$0 sm:$0xff] }
  0x19   :  { %307 = vmatpush3.bf16.msra.mxu1 %v332_v5  ;;  %v275_v23 = vld [vmem:[%s465_s5] ss:$0 sm:$0xff] }
  0x1a   :  { %308 = vmatprep.subr.bf16.mxu1 %v366_v0  ;;  %v285_v28 = vld [vmem:[%s467_s7] ss:$0 sm:$0xff] }
  0x1b   :  { %v284_v29 = vld [vmem:[%s466_s6] ss:$0 sm:$0xff] }
  0x1c   :  { %v286_v36 = vld [vmem:[%s468_s8] ss:$0 sm:$0xff] }
  0x1d   :  { %309 = vmatpush3.bf16.msra.mxu1 %v333_v6 }
  0x1e   :  { %310 = vmatprep.subr.bf16.mxu1 %v366_v0 }
  0x21   :  { %311 = vmatpush3.bf16.msra.mxu1 %v334_v7 }
  0x22   :  { %312 = vmatprep.subr.bf16.mxu1 %v366_v0 }
  0x25   :  { %313 = vmatpush3.bf16.msra.mxu1 %v335_v8 }
  0x26   :  { %314 = vmatprep.subr.bf16.mxu1 %v366_v0 }
  0x29   :  { %315 = vmatpush3.bf16.msra.mxu1 %v336_v9 }
  0x2a   :  { %316 = vmatprep.subr.bf16.mxu1 %v366_v0 }
  0x2d   :  { %317 = vmatpush3.bf16.msra.mxu1 %v337_v13 }
  0x2e   :  { %318 = vmatprep.subr.bf16.mxu1 %v366_v0 }
  0x31   :  { %319 = vmatpush3.bf16.msra.mxu1 %v338_v14 }
  0x87   :  { %v55_v10 = vpop.permute.xlu0 %54 }
  0x88   :  { %58 = vst.msk [vmem:[#allocation2] sm:$0xff] %vm57_vm3, %v55_v10 }
  0x8f   :  { %v59_v11 = vld [vmem:[#allocation2] sm:$0xff] }
  0x90   :  { %v60_v12 = vpack.c.bf16 %v59_v11, %v59_v11 }
  0x92   :  { %301 = vmatmul.mubr.msk.bf16.vlgmr.msra.gmra.mrb[0].mxu0 %vm47_vm0, %v60_v12 }
 0x165   :  { %v113_v16 = vpop.f32.mrb[0].mxu0 }
 0x166   :  { %v114_v17 = vadd.f32 %v272_v15, %v113_v16  ;;  %v302_v18 = vpop.f32.mrb[1].mxu0 }
 0x167   :  { %v116_v19 = vpop.f32.mrb[2].mxu0 }
 0x168   :  { %v119_v20 = vmax.f32 %v114_v17, 0.0  ;;  %v303_v21 = vpop.f32.mrb[3].mxu0 }
 0x16a   :  { %v120_v22 = vpack.c.bf16 %v119_v20, %v119_v20 }
 0x16c   :  { %321 = vmatmul.mubr.bf16.vlgmr.msra.gmra.mrb[0].mxu1 %v120_v22 }
 0x23f   :  { %v226_v24 = vpop.f32.mrb[0].mxu1 }
 0x240   :  { %v227_v25 = vadd.f32 %v275_v23, %v226_v24  ;;  %v322_v26 = vpop.f32.mrb[1].mxu1 }
 0x241   :  { %v229_v27 = vpop.f32.mrb[2].mxu1 }
 0x242   :  { %v232_v30 = vmax.f32 %v227_v25, 0.0  ;;  %v323_v31 = vpop.f32.mrb[3].mxu1 }
 0x244   :  { %v250_v32 = vmul.f32 %v285_v28, %v232_v30  ;;  %v240_v33 = vmul.f32 %v284_v29, %v232_v30 }
 0x246   :  { %251 = vadd.xlane.f32.xlu1 %v250_v32  ;;  %241 = vadd.xlane.f32.xlu0 %v240_v33 }
 0x2d3   :  { %v252_v37 = vpop.xlane.xlu1 %251  ;;  %v242_v38 = vpop.xlane.xlu0 %241 }
 0x2d4   :  { %v256_v39 = vsel %vm255_vm4, %v242_v38, %v252_v37 }
 0x2d5   :  { %v264_v40 = vadd.f32 %v286_v36, %v256_v39 }
 0x2d7   :  { %266 = vst.msk [vmem:[%s469_s9] sm:$0xff] %vm265_vm5, %v264_v40 }
 0x2d8   :  { %271 = vsyncpa [#allocation4], 1 }

</bundles_post_ra>
